<compile_context>
chip_gen: v7x
topology: tpu7x:2x2x1
jax: 0.10.0
libtpu: 0.0.40
codegen_flags: <defaults>
</compile_context>

<pallas_src>
import functools

import jax
import jax.numpy as jnp
from jax import lax
from jax.experimental import pallas as pl
from jax.experimental.pallas import tpu as pltpu


_TARGET_WORKING_SET_BYTES = 16 * 1024 * 1024  # double-buffered tiles + tail vectors


def _round_up(x, m):
    return ((x + m - 1) // m) * m


def _sublane_granule(itemsize):
    # Native sublane packing: (8,128) for 4-byte, (16,128) bf16, (32,128) int8/fp8.
    return max(8, 32 // max(int(itemsize), 1))


def _tensorcores_per_chip():
    """2 on v7x-class (2 TensorCores / chip); 1 on v5e / v6e; safe fallback 1."""
    try:
        kind = jax.devices()[0].device_kind.lower()
        if "v7" in kind:
            return 2
    except Exception:
        pass
    return 1


def _row_major_tile(n_per_split, c, itemsize):
    """Row tile for the (N, C) layout, sized by padded VMEM footprint."""
    granule = _sublane_granule(itemsize)
    lanes = _round_up(c, 128)
    # 2 double-buffered input tiles + f32 working/exp copies + ~8 lane-padded f32
    # (tile, 1) tail vectors (max, gather, lse, logpt chain, accumulator scratch).
    per_row = 2 * lanes * itemsize + 2 * lanes * 4 + 8 * 128 * 4
    t = _TARGET_WORKING_SET_BYTES // per_row
    t = max(granule, (t // granule) * granule)
    cap = max(granule, _round_up(n_per_split, granule))
    return min(t, cap)


def _class_major_tile(n_per_split, c, itemsize):
    """Column (example) tile for the (C, N) layout, sized by padded footprint."""
    sub = _round_up(c, _sublane_granule(itemsize))
    # 2 double-buffered input tiles + f32 working copy + ~16 lane-dense f32 (1, tile)
    # tail vectors (incl. the accumulator scratch).
    per_col = 2 * sub * itemsize + _round_up(c, 8) * 4 + 16 * 4
    t = _TARGET_WORKING_SET_BYTES // per_col
    t = max(128, (t // 128) * 128)
    cap = max(128, _round_up(n_per_split, 128))
    return min(t, cap)


def _focal_weight(one_minus_pt, gamma):
    """(1 - pt)**gamma; integer gamma uses VPU multiplies (no EUP log/exp)."""
    g = float(gamma)
    if g == int(g) and int(g) >= 0:
        out = jnp.ones_like(one_minus_pt)
        for _ in range(int(g)):
            out = out * one_minus_pt
        return out
    return one_minus_pt ** jnp.float32(g)


def _focal_loss_row_major_kernel(logits_ref, target_ref, out_ref, acc_ref, *,
                                 gamma, alpha, n_valid, tile, blocks_per_split):
    p = pl.program_id(0)          # TensorCore split ("parallel")
    i = pl.program_id(1)          # reduction sweep over row tiles ("arbitrary")

    @pl.when(i == 0)
    def _():
        acc_ref[...] = jnp.zeros_like(acc_ref)

    x = logits_ref[...].astype(jnp.float32)                    # (tile, C)
    t = target_ref[...]                                        # (tile, 1) int32

    col = lax.broadcasted_iota(jnp.int32, x.shape, 1)
    # max and target-gather are independent lane reductions over x.
    m = jnp.max(x, axis=-1, keepdims=True)                     # (tile, 1)
    gathered = jnp.sum(jnp.where(col == t, x, 0.0), axis=-1, keepdims=True)
    lse = jnp.log(jnp.sum(jnp.exp(x - m), axis=-1, keepdims=True))

    logpt = jnp.minimum(gathered - m - lse, 0.0)               # clamp: pt <= 1
    pt = jnp.exp(logpt)
    w = jnp.where(t > 0, jnp.float32(alpha), jnp.float32(1.0 - alpha))
    focal = _focal_weight(jnp.maximum(1.0 - pt, 0.0), gamma)
    loss = -focal * (logpt * w)                                # (tile, 1)

    # Mask padded rows.
    row = lax.broadcasted_iota(jnp.int32, loss.shape, 0) + (p * blocks_per_split + i) * tile
    loss = jnp.where(row < n_valid, loss, 0.0)

    acc_ref[...] += loss                                       # pure VPU add per step

    # Single scalar reduction + lane-dense output write, once per sweep.
    @pl.when(i == pl.num_programs(1) - 1)
    def _():
        out_ref[...] = jnp.zeros_like(out_ref) + jnp.sum(acc_ref[...])


def _focal_loss_class_major_kernel(logits_ref, target_ref, out_ref, acc_ref, *,
                                   gamma, alpha, n_valid, tile, blocks_per_split):
    p = pl.program_id(0)
    i = pl.program_id(1)

    @pl.when(i == 0)
    def _():
        acc_ref[...] = jnp.zeros_like(acc_ref)

    x = logits_ref[...].astype(jnp.float32)                    # (C, tile)
    t = target_ref[...]                                        # (1, tile) int32

    cls = lax.broadcasted_iota(jnp.int32, x.shape, 0)
    # Class reductions along the sublane axis; tail math fully lane-dense.
    m = jnp.max(x, axis=0, keepdims=True)                      # (1, tile)
    gathered = jnp.sum(jnp.where(cls == t, x, 0.0), axis=0, keepdims=True)
    lse = jnp.log(jnp.sum(jnp.exp(x - m), axis=0, keepdims=True))

    logpt = jnp.minimum(gathered - m - lse, 0.0)               # clamp: pt <= 1
    pt = jnp.exp(logpt)
    w = jnp.where(t > 0, jnp.float32(alpha), jnp.float32(1.0 - alpha))
    focal = _focal_weight(jnp.maximum(1.0 - pt, 0.0), gamma)
    loss = -focal * (logpt * w)                                # (1, tile) lane-dense

    colidx = lax.broadcasted_iota(jnp.int32, loss.shape, 1) + (p * blocks_per_split + i) * tile
    loss = jnp.where(colidx < n_valid, loss, 0.0)

    acc_ref[...] += loss                                       # pure VPU add per step

    @pl.when(i == pl.num_programs(1) - 1)
    def _():
        out_ref[...] = jnp.zeros_like(out_ref) + jnp.sum(acc_ref[...])


def focal_loss(logits, target, *, gamma=2.0, alpha=0.25, size_average=True,
               class_major=None, num_splits=None):
    """Focal loss over (N, C) logits and (N,) integer targets. Returns a scalar."""
    n, c = logits.shape
    target = target.reshape(-1).astype(jnp.int32)
    itemsize = jnp.dtype(logits.dtype).itemsize

    if class_major is None:
        class_major = c <= 64                 # relation-head C=51 -> class-major layout
    if num_splits is None:
        num_splits = _tensorcores_per_chip()
        # Only split across TensorCores when each one gets a full tile's worth of work.
        if num_splits > 1 and n * _round_up(c, 128) * itemsize < num_splits * (2 << 20):
            num_splits = 1
    num_splits = max(1, int(num_splits))

    n_per_split = pl.cdiv(n, num_splits)
    if class_major:
        tile = _class_major_tile(n_per_split, c, itemsize)
    else:
        tile = _row_major_tile(n_per_split, c, itemsize)

    blocks_per_split = pl.cdiv(n, num_splits * tile)
    n_pad = num_splits * blocks_per_split * tile

    if class_major:
        # TODO(synk): fuse this transpose into the logits producer; done here it costs
        #             one extra XLA pass over the (small-C) logits.
        x = jnp.swapaxes(logits, 0, 1)                          # (C, N)
        if n_pad != n:
            x = jnp.pad(x, ((0, 0), (0, n_pad - n)))
            target = jnp.pad(target, (0, n_pad - n))
        tgt = target.reshape(1, n_pad)
        kernel = functools.partial(
            _focal_loss_class_major_kernel, gamma=float(gamma), alpha=float(alpha),
            n_valid=n, tile=tile, blocks_per_split=blocks_per_split)
        in_specs = [
            pl.BlockSpec((c, tile), lambda p, i: (0, p * blocks_per_split + i)),
            pl.BlockSpec((1, tile), lambda p, i: (0, p * blocks_per_split + i)),
        ]
        acc_shape = (1, tile)
        logits_tile_bytes = _round_up(c, _sublane_granule(itemsize)) * tile * itemsize
        vec_tile_bytes = 8 * tile * 4
    else:
        x = logits
        if n_pad != n:
            x = jnp.pad(x, ((0, n_pad - n), (0, 0)))
            target = jnp.pad(target, (0, n_pad - n))
        tgt = target.reshape(n_pad, 1)
        kernel = functools.partial(
            _focal_loss_row_major_kernel, gamma=float(gamma), alpha=float(alpha),
            n_valid=n, tile=tile, blocks_per_split=blocks_per_split)
        in_specs = [
            pl.BlockSpec((tile, c), lambda p, i: (p * blocks_per_split + i, 0)),
            pl.BlockSpec((tile, 1), lambda p, i: (p * blocks_per_split + i, 0)),
        ]
        acc_shape = (tile, 1)
        logits_tile_bytes = tile * _round_up(c, 128) * itemsize
        vec_tile_bytes = tile * 128 * 4

    # VMEM budget: double-buffered logits/target tiles + accumulator scratch +
    # resident (8,128) output blocks + compiler headroom. Safe on v7x's 64 MiB VMEM.
    needed = (2 * (logits_tile_bytes + vec_tile_bytes) + vec_tile_bytes
              + 2 * num_splits * 8 * 128 * 4)
    vmem_limit = int(min(48 << 20, max(32 << 20, needed + (8 << 20))))

    partials = pl.pallas_call(
        kernel,
        out_shape=jax.ShapeDtypeStruct((num_splits, 8, 128), jnp.float32),
        grid_spec=pltpu.PrefetchScalarGridSpec(
            num_scalar_prefetch=0,
            grid=(num_splits, blocks_per_split),
            in_specs=in_specs,
            # One lane-dense (8,128) partial-sum block per split; resident across the
            # reduction axis and written exactly once, at its last step.
            out_specs=pl.BlockSpec((1, 8, 128), lambda p, i: (p, 0, 0)),
            scratch_shapes=[pltpu.VMEM(acc_shape, jnp.float32)],
        ),
        compiler_params=pltpu.CompilerParams(
            dimension_semantics=("parallel", "arbitrary"),
            vmem_limit_bytes=vmem_limit,
        ),
    )(x, tgt)

    total = jnp.sum(partials[:, 0, 0])
    if size_average:
        return total / jnp.float32(n)
    return total


def _reference_focal_loss(logits, target, gamma, alpha, size_average):
    """Pure-JAX reference mirroring the PyTorch module."""
    target = target.reshape(-1)
    log_sm = jax.nn.log_softmax(logits.astype(jnp.float32), axis=-1)
    logpt = jnp.take_along_axis(log_sm, target[:, None], axis=-1)[:, 0]
    pt = jnp.exp(logpt)
    logpt = logpt * alpha * (target > 0) + logpt * (1.0 - alpha) * (target <= 0)
    loss = -1.0 * (1.0 - pt) ** gamma * logpt
    return loss.mean() if size_average else loss.sum()


if __name__ == "__main__":
    key = jax.random.PRNGKey(0)
    k1, k2, k3, k4, k5, k6, k7, k8 = jax.random.split(key, 8)

    # Case 1: tiny N, small C -> class-major path, integer gamma, mean reduction.
    N1, C1 = 10, 32
    logits1 = jax.random.normal(k1, (N1, C1), dtype=jnp.float32)
    target1 = jax.random.randint(k2, (N1,), 0, C1, dtype=jnp.int32)
    out1 = jax.block_until_ready(focal_loss(logits1, target1, gamma=2.0, alpha=0.25,
                                            size_average=True))
    ref1 = _reference_focal_loss(logits1, target1, 2.0, 0.25, True)
    assert jnp.allclose(out1, ref1, rtol=1e-5, atol=1e-5), (out1, ref1)

    # Case 2: relation-head-like shape (class-major), non-integer gamma (clamped pow
    # path), sum reduction.
    N2, C2 = 200, 51
    logits2 = jax.random.normal(k3, (N2, C2), dtype=jnp.float32)
    target2 = jax.random.randint(k4, (N2,), 0, C2, dtype=jnp.int32)
    out2 = jax.block_until_ready(focal_loss(logits2, target2, gamma=1.5, alpha=0.25,
                                            size_average=False))
    ref2 = _reference_focal_loss(logits2, target2, 1.5, 0.25, False)
    assert jnp.allclose(out2, ref2, rtol=1e-5, atol=1e-4), (out2, ref2)

    # Case 2b: same inputs, forced 2-way split (exercises padding + both sweeps;
    # harmless on single-TC parts, maps to both TensorCores on v7x).
    out2b = jax.block_until_ready(focal_loss(logits2, target2, gamma=1.5, alpha=0.25,
                                             size_average=False, num_splits=2))
    assert jnp.allclose(out2b, ref2, rtol=1e-5, atol=1e-4), (out2b, ref2)

    # Case 2c: same inputs through the row-major kernel (cross-checks both layouts).
    out2c = jax.block_until_ready(focal_loss(logits2, target2, gamma=1.5, alpha=0.25,
                                             size_average=False, class_major=False))
    assert jnp.allclose(out2c, ref2, rtol=1e-5, atol=1e-4), (out2c, ref2)

    # Case 3: wider class dim -> row-major path, mean reduction.
    N3, C3 = 37, 80
    logits3 = jax.random.normal(k5, (N3, C3), dtype=jnp.float32)
    target3 = jax.random.randint(k6, (N3,), 0, C3, dtype=jnp.int32)
    out3 = jax.block_until_ready(focal_loss(logits3, target3, gamma=2.0, alpha=0.3,
                                            size_average=True))
    ref3 = _reference_focal_loss(logits3, target3, 2.0, 0.3, True)
    assert jnp.allclose(out3, ref3, rtol=1e-5, atol=1e-5), (out3, ref3)

    # Case 4: bf16 logits (halved HBM traffic; 16-row sublane granule), sum reduction.
    N4, C4 = 24, 96
    logits4 = jax.random.normal(k7, (N4, C4), dtype=jnp.float32).astype(jnp.bfloat16)
    target4 = jax.random.randint(k8, (N4,), 0, C4, dtype=jnp.int32)
    out4 = jax.block_until_ready(focal_loss(logits4, target4, gamma=2.0, alpha=0.25,
                                            size_average=False))
    ref4 = _reference_focal_loss(logits4.astype(jnp.float32), target4, 2.0, 0.25, False)
    assert jnp.allclose(out4, ref4, rtol=1e-4, atol=1e-4), (out4, ref4)

    print("KERNEL_OK")
</pallas_src>

<mosaic_0001>
module attributes {stable_mosaic.version = 11 : i64} {
  func.func @_focal_loss_class_major_kernel(%arg0: i32, %arg1: i32, %arg2: memref<32x128xf32, #tpu.memory_space<vmem>>, %arg3: memref<1x128xi32, #tpu.memory_space<vmem>>, %arg4: memref<1x8x128xf32, #tpu.memory_space<vmem>>, %arg5: memref<1x128xf32, #tpu.memory_space<vmem>>) attributes {dimension_semantics = [#tpu.dimension_semantics<parallel>, #tpu.dimension_semantics<arbitrary>], iteration_bounds = array<i64: 1, 1>, scalar_prefetch = 0 : i64, scratch_operands = 1 : i64, tpu.core_type = #tpu.core_type<tc>, window_params = [{transform_indices = @transform_0, window_bounds = array<i64: 32, 128>}, {transform_indices = @transform_1, window_bounds = array<i64: 1, 128>}, {transform_indices = @transform_2, window_bounds = array<i64: 1, 8, 128>}]} {
    %c0_i32 = arith.constant 0 : i32
    %0 = arith.cmpi eq, %arg1, %c0_i32 : i32
    %1 = arith.extui %0 : i1 to i32
    %c0_i32_0 = arith.constant 0 : i32
    %2 = arith.cmpi ne, %1, %c0_i32_0 : i32
    scf.if %2 {
      %cst_22 = arith.constant 0.000000e+00 : f32
      %57 = vector.broadcast %cst_22 : f32 to vector<1x128xf32>
      %c0_23 = arith.constant 0 : index
      %c0_24 = arith.constant 0 : index
      %58 = vector.load %arg5[%c0_23, %c0_24] : memref<1x128xf32, #tpu.memory_space<vmem>>, vector<1x128xf32>
      tpu.vector_store %arg5[%c0_23, %c0_24], %57 {strides = array<i32>} : memref<1x128xf32, #tpu.memory_space<vmem>>, vector<1x128xf32>,
    } else {
    }
    %c0 = arith.constant 0 : index
    %c0_1 = arith.constant 0 : index
    %3 = vector.load %arg2[%c0, %c0_1] : memref<32x128xf32, #tpu.memory_space<vmem>>, vector<32x128xf32>
    %c0_2 = arith.constant 0 : index
    %c0_3 = arith.constant 0 : index
    %4 = vector.load %arg3[%c0_2, %c0_3] : memref<1x128xi32, #tpu.memory_space<vmem>>, vector<1x128xi32>
    %5 = tpu.iota {dimensions = array<i32: 0>} : vector<32x128xi32>
    %cst = arith.constant dense<0xFF800000> : vector<128xf32>
    %6 = vector.multi_reduction <maximumf>, %3, %cst [0] : vector<32x128xf32> to vector<128xf32>
    %7 = vector.shape_cast %6 : vector<128xf32> to vector<1x128xf32>
    %8 = vector.broadcast %4 : vector<1x128xi32> to vector<32x128xi32>
    %9 = arith.cmpi eq, %5, %8 : vector<32x128xi32>
    %cst_4 = arith.constant 0.000000e+00 : f32
    %10 = vector.broadcast %cst_4 : f32 to vector<32x128xf32>
    %11 = arith.select %9, %3, %10 : vector<32x128xi1>, vector<32x128xf32>
    %cst_5 = arith.constant dense<0.000000e+00> : vector<128xf32>
    %12 = vector.multi_reduction <add>, %11, %cst_5 [0] : vector<32x128xf32> to vector<128xf32>
    %13 = vector.shape_cast %12 : vector<128xf32> to vector<1x128xf32>
    %14 = vector.broadcast %7 : vector<1x128xf32> to vector<32x128xf32>
    %15 = arith.subf %3, %14 : vector<32x128xf32>
    %16 = math.exp %15 : vector<32x128xf32>
    %cst_6 = arith.constant dense<0.000000e+00> : vector<128xf32>
    %17 = vector.multi_reduction <add>, %16, %cst_6 [0] : vector<32x128xf32> to vector<128xf32>
    %18 = vector.shape_cast %17 : vector<128xf32> to vector<1x128xf32>
    %19 = math.log %18 : vector<1x128xf32>
    %20 = arith.subf %13, %7 : vector<1x128xf32>
    %21 = arith.subf %20, %19 : vector<1x128xf32>
    %cst_7 = arith.constant 0.000000e+00 : f32
    %22 = vector.broadcast %cst_7 : f32 to vector<1x128xf32>
    %23 = arith.minimumf %21, %22 : vector<1x128xf32>
    %24 = math.exp %23 : vector<1x128xf32>
    %c0_i32_8 = arith.constant 0 : i32
    %25 = vector.broadcast %c0_i32_8 : i32 to vector<1x128xi32>
    %26 = arith.cmpi sgt, %4, %25 : vector<1x128xi32>
    %cst_9 = arith.constant 2.500000e-01 : f32
    %cst_10 = arith.constant 7.500000e-01 : f32
    %27 = vector.broadcast %cst_9 : f32 to vector<1x128xf32>
    %28 = vector.broadcast %cst_10 : f32 to vector<1x128xf32>
    %29 = arith.select %26, %27, %28 : vector<1x128xi1>, vector<1x128xf32>
    %cst_11 = arith.constant 1.000000e+00 : f32
    %30 = vector.broadcast %cst_11 : f32 to vector<1x128xf32>
    %31 = arith.subf %30, %24 : vector<1x128xf32>
    %cst_12 = arith.constant 0.000000e+00 : f32
    %32 = vector.broadcast %cst_12 : f32 to vector<1x128xf32>
    %33 = arith.maximumf %31, %32 : vector<1x128xf32>
    %cst_13 = arith.constant 1.000000e+00 : f32
    %34 = vector.broadcast %cst_13 : f32 to vector<1x128xf32>
    %35 = arith.mulf %34, %33 : vector<1x128xf32>
    %36 = arith.mulf %35, %33 : vector<1x128xf32>
    %cst_14 = arith.constant 0.000000e+00 : f32
    %37 = vector.broadcast %cst_14 : f32 to vector<1x128xf32>
    %38 = arith.subf %37, %36 : vector<1x128xf32>
    %39 = arith.mulf %23, %29 : vector<1x128xf32>
    %40 = arith.mulf %38, %39 : vector<1x128xf32>
    %41 = tpu.iota {dimensions = array<i32: 1>} : vector<1x128xi32>
    %c1_i32 = arith.constant 1 : i32
    %42 = arith.muli %arg0, %c1_i32 : i32
    %43 = arith.addi %42, %arg1 : i32
    %c128_i32 = arith.constant 128 : i32
    %44 = arith.muli %43, %c128_i32 : i32
    %45 = vector.broadcast %44 : i32 to vector<1x128xi32>
    %46 = arith.addi %41, %45 : vector<1x128xi32>
    %c10_i32 = arith.constant 10 : i32
    %47 = vector.broadcast %c10_i32 : i32 to vector<1x128xi32>
    %48 = arith.cmpi slt, %46, %47 : vector<1x128xi32>
    %cst_15 = arith.constant 0.000000e+00 : f32
    %49 = vector.broadcast %cst_15 : f32 to vector<1x128xf32>
    %50 = arith.select %48, %40, %49 : vector<1x128xi1>, vector<1x128xf32>
    %c0_16 = arith.constant 0 : index
    %c0_17 = arith.constant 0 : index
    %51 = vector.load %arg5[%c0_16, %c0_17] : memref<1x128xf32, #tpu.memory_space<vmem>>, vector<1x128xf32>
    %52 = arith.addf %51, %50 : vector<1x128xf32>
    %c0_18 = arith.constant 0 : index
    %c0_19 = arith.constant 0 : index
    %53 = vector.load %arg5[%c0_18, %c0_19] : memref<1x128xf32, #tpu.memory_space<vmem>>, vector<1x128xf32>
    tpu.vector_store %arg5[%c0_18, %c0_19], %52 {strides = array<i32>} : memref<1x128xf32, #tpu.memory_space<vmem>>, vector<1x128xf32>,
    %c0_i32_20 = arith.constant 0 : i32
    %54 = arith.cmpi eq, %arg1, %c0_i32_20 : i32
    %55 = arith.extui %54 : i1 to i32
    %c0_i32_21 = arith.constant 0 : i32
    %56 = arith.cmpi ne, %55, %c0_i32_21 : i32
    scf.if %56 {
      %cst_22 = arith.constant 0.000000e+00 : f32
      %57 = vector.broadcast %cst_22 : f32 to vector<1x8x128xf32>
      %c0_23 = arith.constant 0 : index
      %c0_24 = arith.constant 0 : index
      %58 = vector.load %arg5[%c0_23, %c0_24] : memref<1x128xf32, #tpu.memory_space<vmem>>, vector<1x128xf32>
      %59 = vector.shape_cast %58 : vector<1x128xf32> to vector<1x1x128xf32>
      %cst_25 = arith.constant dense<0.000000e+00> : vector<1xf32>
      %60 = vector.multi_reduction <add>, %59, %cst_25 [1, 2] : vector<1x1x128xf32> to vector<1xf32>
      %61 = vector.shape_cast %60 : vector<1xf32> to vector<1x1x1xf32>
      %62 = vector.extract %61[0, 0, 0] : f32 from vector<1x1x1xf32>
      %63 = vector.broadcast %62 : f32 to vector<1x8x128xf32>
      %64 = arith.addf %57, %63 : vector<1x8x128xf32>
      %c0_26 = arith.constant 0 : index
      %c0_27 = arith.constant 0 : index
      %c0_28 = arith.constant 0 : index
      %65 = vector.load %arg4[%c0_26, %c0_27, %c0_28] : memref<1x8x128xf32, #tpu.memory_space<vmem>>, vector<1x8x128xf32>
      tpu.vector_store %arg4[%c0_26, %c0_27, %c0_28], %64 {strides = array<i32>} : memref<1x8x128xf32, #tpu.memory_space<vmem>>, vector<1x8x128xf32>,
    } else {
    }
    return
  }
  func.func @transform_0(%arg0: i32, %arg1: i32) -> (i32, i32) {
    %c1_i32 = arith.constant 1 : i32
    %0 = arith.muli %arg0, %c1_i32 : i32
    %1 = arith.addi %0, %arg1 : i32
    %c0_i32 = arith.constant 0 : i32
    %c0_i32_0 = arith.constant 0 : i32
    return %c0_i32, %1 : i32, i32
  }
  func.func @transform_1(%arg0: i32, %arg1: i32) -> (i32, i32) {
    %c1_i32 = arith.constant 1 : i32
    %0 = arith.muli %arg0, %c1_i32 : i32
    %1 = arith.addi %0, %arg1 : i32
    %c0_i32 = arith.constant 0 : i32
    %c0_i32_0 = arith.constant 0 : i32
    return %c0_i32, %1 : i32, i32
  }
  func.func @transform_2(%arg0: i32, %arg1: i32) -> (i32, i32, i32) {
    %c0_i32 = arith.constant 0 : i32
    %c0_i32_0 = arith.constant 0 : i32
    %c0_i32_1 = arith.constant 0 : i32
    return %arg0, %c0_i32, %c0_i32_0 : i32, i32, i32
  }
}

</mosaic_0001>

<bundles_post_ra>
// kernel: tpu_custom_call.1
= control target key start
LH: loop header
LB: loop body
LE: loop exit
PB: predicated region body
PF: predicated region fallthrough
CT: control target
= control target key end

     0   :  { %7 = vsyncpa [#allocation4], 0  ;;  %s294_s0 = inlined_call_operand.hbm [shape: f32[32,128], index: 0, kind: input, shape index: {}]   ;;  %s295_s1 = inlined_call_operand.vmem [shape: s32[1,128], index: 1, kind: input, shape index: {}]   ;;  %s296_s2 = inlined_call_operand.hbm [shape: f32[1,8,128], index: 2, kind: output, shape index: {}]  }
   0x1   :  { %8 = vsyncpa [#allocation5], 0  ;;  %s240_s9 = smov [#allocation3]   ;;  %s192_s13 = scalar_lea.hbm %s294_s0, 512 }
   0x2   :  { %s17_s10 = sshll.u32 %s240_s9, 4  ;;  %p193_p0 = scmp.ne.s32.totalorder %s294_s0, %s192_s13  ;;  %s18_s10 = int_to_ptr.vmem [resolvable:$true] %s17_s10 }
   0x3   :  { %p196_p1 = scmp.lt.u32.totalorder %s192_s13, %s294_s0 }
   0x5   :  { %p198_p2 = pnand %p196_p1, %p193_p0 }
   0x7   :  { %201 = shalt.err (!%p198_p2)
}
   0x8   :  { %s202_s18 = scalar_lea.vmem %s18_s10, 512  ;;  %p207_p4 = scmp.lt.s32.totalorder %s18_s10, %s18_s10 }
   0x9   :  { %p203_p3 = scmp.ne.s32.totalorder %s18_s10, %s202_s18  ;;  %p208_p5 = scmp.lt.s32.totalorder %s202_s18, %s202_s18 }
   0xb   :  { %p209_p6 = por %p208_p5, %p207_p4 }
   0xd   :  { %p210_p7 = pnand %p209_p6, %p203_p3 }
   0xf   :  { %213 = shalt.err (!%p210_p7)
}
  0x10   :  { %s241_s19 = smov 128   ;;  %s242_s20 = smov 8  }
  0x11   :  { %23 = dma.hbm_to_vmem [thread:$0]  %s294_s0, 512, %s18_s10, [#allocation4], %s241_s19, %s241_s19, %s242_s20  }
  0x12   :  { %236 = dma.done.wait [#allocation4], 512  }
  0x13   :  { %237 = vsyncadd [#allocation4], 4294966784  ;;  %v243_v0 = vmov 0.0   ;;  %v49_v1 = vld [vmem:[#allocation3] sm:$0xff]  ;;  %v50_v2 = vld [vmem:[#allocation3 + $0x8] sm:$0xff]  ;;  %v54_v7 = vlaneseq  ;;  %vm140_vm6 = vcmask 1040384  }
  0x14   :  { %48 = vst [vmem:[#allocation2] sm:$0x1] %v243_v0  ;;  %v51_v3 = vld [vmem:[#allocation3 + $0x10] sm:$0xff]  ;;  %v52_v4 = vld [vmem:[#allocation3 + $0x18] sm:$0xff]  ;;  %v59_v5 = vmax.f32 %v49_v1, %v50_v2  ;;  %v244_v0 = vmov 0.75  }
  0x15   :  { %v60_v6 = vmax.f32 %v51_v3, %v52_v4  ;;  %v55_v10 = vshrl.u32 %v54_v7, 7  ;;  %v277_v14 = vld [vmem:[%s295_s1] sm:$0x1]  ;;  %s245_s1 = smov [#allocation6]  }
  0x16   :  { %vm117_vm4 = vcmp.gt.s32.totalorder %v277_v14, 0  ;;  %s160_s24 = sshll.u32 %s245_s1, 4  ;;  %s161_s24 = int_to_ptr.vmem [resolvable:$true] %s160_s24 }
  0x17   :  { %v61_v8 = vmax.f32 %v59_v5, %v60_v6  ;;  %v70_v13 = vsub.s32 0, %v55_v10  ;;  %v56_v17 = vadd.s32 8, %v55_v10  ;;  %v57_v23 = vadd.s32 16, %v55_v10  ;;  %s214_s26 = scalar_lea.vmem %s161_s24, 128  ;;  %p219_p9 = scmp.lt.s32.totalorder %s161_s24, %s161_s24 }
  0x18   :  { %v58_v31 = vadd.s32 24, %v55_v10  ;;  %p215_p8 = scmp.ne.s32.totalorder %s161_s24, %s214_s26  ;;  %p220_p10 = scmp.lt.s32.totalorder %s214_s26, %s214_s26 }
  0x19   :  { %v62_v9 = vrot.slane %v61_v8, 4  ;;  %v71_v18 = vrot.slane %v277_v14, %v70_v13 }
  0x1a   :  { %p221_p11 = por %p220_p10, %p219_p9 }
  0x1b   :  { %v63_v11 = vmax.f32 %v61_v8, %v62_v9  ;;  %vm72_vm0 = vcmp.eq.s32.totalorder %v55_v10, %v71_v18  ;;  %vm73_vm1 = vcmp.eq.s32.totalorder %v56_v17, %v71_v18  ;;  %vm74_vm2 = vcmp.eq.s32.totalorder %v57_v23, %v71_v18  ;;  %v133_v9 = vld [vmem:[#allocation2] sm:$0x1] }
  0x1c   :  { %v76_v29 = vsel %vm72_vm0, %v49_v1, 0.0  ;;  %v77_v30 = vsel %vm73_vm1, %v50_v2, 0.0  ;;  %v78_v33 = vsel %vm74_vm2, %v51_v3, 0.0  ;;  %vm75_vm3 = vcmp.eq.s32.totalorder %v58_v31, %v71_v18  ;;  %p222_p12 = pnand %p221_p11, %p215_p8 }
  0x1d   :  { %v64_v12 = vrot.slane %v63_v11, 2  ;;  %v80_v32 = vadd.f32 %v77_v30, %v76_v29  ;;  %v79_v35 = vsel %vm75_vm3, %v52_v4, 0.0 }
  0x1f   :  { %v65_v15 = vmax.f32 %v63_v11, %v64_v12  ;;  %v81_v34 = vadd.f32 %v80_v32, %v78_v33 }
  0x21   :  { %v66_v16 = vrot.slane %v65_v15, 1  ;;  %v82_v38 = vadd.f32 %v81_v34, %v79_v35 }
  0x23   :  { %v67_v19 = vmax.f32 %v65_v15, %v66_v16  ;;  %v83_v43 = vrot.slane %v82_v38, 4 }
  0x25   :  { %v89_v20 = vsub.f32 %v49_v1, %v67_v19  ;;  %v90_v21 = vsub.f32 %v50_v2, %v67_v19  ;;  %v91_v22 = vsub.f32 %v51_v3, %v67_v19  ;;  %v92_v24 = vsub.f32 %v52_v4, %v67_v19 }
  0x26   :  { %v84_v46 = vadd.f32 %v83_v43, %v82_v38  ;;  %v118_v1 = vsel %vm117_vm4, 0.25, %v244_v0  ;;  %v126_v3 = vand.u32 127, %v54_v7 }
  0x27   :  { %v93_v25 = vmul.f32 1.442695, %v89_v20  ;;  %v95_v26 = vmul.f32 1.442695, %v90_v21  ;;  %v97_v27 = vmul.f32 1.442695, %v91_v22 }
  0x28   :  { %v99_v28 = vmul.f32 1.442695, %v92_v24  ;;  %v85_v49 = vrot.slane %v84_v46, 2  ;;  %vm131_vm5 = vcmp.lt.s32.totalorder %v126_v3, 10 }
  0x29   :  { %180 = vpow2.f32 %v93_v25 }
  0x2a   :  { %182 = vpow2.f32 %v95_v26  ;;  %v86_v52 = vadd.f32 %v85_v49, %v84_v46 }
  0x2b   :  { %184 = vpow2.f32 %v97_v27 }
  0x2c   :  { %186 = vpow2.f32 %v99_v28  ;;  %v87_v54 = vrot.slane %v86_v52, 1 }
  0x2e   :  { %v88_v55 = vadd.f32 %v87_v54, %v86_v52 }
  0x30   :  { %v112_v56 = vsub.f32 %v88_v55, %v67_v19 }
  0x33   :  { %v181_v36 = vpop.eup %180 }
  0x34   :  { %v183_v37 = vpop.eup %182 }
  0x35   :  { %v185_v39 = vpop.eup %184  ;;  %v101_v40 = vadd.f32 %v183_v37, %v181_v36 }
  0x36   :  { %v187_v41 = vpop.eup %186 }
  0x37   :  { %v102_v42 = vadd.f32 %v185_v39, %v101_v40 }
  0x39   :  { %v103_v44 = vadd.f32 %v187_v41, %v102_v42 }
  0x3b   :  { %v104_v45 = vrot.slane %v103_v44, 4 }
  0x3d   :  { %v105_v47 = vadd.f32 %v104_v45, %v103_v44 }
  0x3f   :  { %v106_v48 = vrot.slane %v105_v47, 2 }
  0x41   :  { %v107_v50 = vadd.f32 %v106_v48, %v105_v47 }
  0x43   :  { %v108_v51 = vrot.slane %v107_v50, 1 }
  0x45   :  { %v109_v53 = vadd.f32 %v108_v51, %v107_v50 }
  0x47   :  { %188 = vlog2.f32 %v109_v53 }
  0x51   :  { %v189_v57 = vpop.eup %188 }
  0x52   :  { %v111_v58 = vmul.f32 0.6931472, %v189_v57 }
  0x54   :  { %v113_v59 = vsub.f32 %v112_v56, %v111_v58 }
  0x56   :  { %v114_v60 = vmin.f32 %v113_v59, 0.0 }
  0x58   :  { %v115_v61 = vmul.f32 1.442695, %v114_v60  ;;  %v123_v5 = vmul.f32 %v118_v1, %v114_v60 }
  0x5a   :  { %190 = vpow2.f32 %v115_v61 }
  0x64   :  { %v191_v62 = vpop.eup %190 }
  0x65   :  { %v119_v63 = vsub.f32 1.0, %v191_v62 }
  0x67   :  { %v120_v2 = vmax.f32 %v119_v63, 0.0 }
  0x69   :  { %v121_v4 = vmul.f32 %v120_v2, %v120_v2 }
  0x6b   :  { %v122_v6 = vsub.f32 0.0, %v121_v4 }
  0x6d   :  { %v124_v8 = vmul.f32 %v123_v5, %v122_v6 }
  0x6f   :  { %v132_v10 = vsel %vm131_vm5, %v124_v8, 0.0 }
  0x70   :  { %v134_v11 = vadd.f32 %v133_v9, %v132_v10 }
  0x72   :  { %135 = vst [vmem:[#allocation2] sm:$0x1] %v134_v11 }
  0x79   :  { %v139_v12 = vld [vmem:[#allocation2] sm:$0x1] }
  0x7a   :  { %v141_v13 = vsel %vm140_vm6, %v139_v12, 0.0 }
  0x7b   :  { %142 = vadd.xlane.f32.xlu0 %v141_v13 }
 0x108   :  { %v143_v14 = vpop.xlane.xlu0 %142 }
 0x109   :  { %v144_v15 = vrot.slane %v143_v14, 4 }
 0x10b   :  { %v145_v16 = vadd.f32 %v144_v15, %v143_v14 }
 0x10d   :  { %v146_v17 = vrot.slane %v145_v16, 2 }
 0x10f   :  { %v147_v18 = vadd.f32 %v146_v17, %v145_v16 }
 0x111   :  { %v148_v19 = vrot.slane %v147_v18, 1 }
 0x113   :  { %v149_v7 = vadd.f32 %v148_v19, %v147_v18 }
 0x115   :  { %172 = vpush %v149_v7 }
 0x146   :  { %s173_s25 = spop %172 }
 0x147   :  { %v151_v20 = vstv %s173_s25 }
 0x148   :  { %153 = vst [vmem:[#allocation6] sm:$0xff] %v151_v20 }
 0x149   :  { %225 = shalt.err (!%p222_p12)
}
 0x14a   :  { %s226_s29 = scalar_lea.hbm %s296_s2, 128 }
 0x14b   :  { %p227_p13 = scmp.ne.s32.totalorder %s296_s2, %s226_s29  ;;  %p230_p0 = scmp.lt.u32.totalorder %s226_s29, %s296_s2 }
 0x14d   :  { %p232_p1 = pnand %p230_p0, %p227_p13 }
 0x14f   :  { %235 = shalt.err (!%p232_p1)
}
 0x150   :  { %163 = dma.vmem_to_hbm [thread:$0]  %s161_s24, 128, %s296_s2, [#allocation5]  }
 0x151   :  { %238 = dma.done.wait [#allocation5], 128  }
 0x152   :  { %239 = vsyncadd [#allocation5], 4294967168 }
 0x153   :  { %167 = vsyncpa [#allocation4], 1 }
 0x154   :  { %168 = vsyncpa [#allocation5], 1 }

</bundles_post_ra>
